<compile_context>
chip_gen: v7x
topology: tpu7x:2x2x1
jax: 0.10.0
libtpu: 0.0.40
codegen_flags: <defaults>
</compile_context>

<pallas_src>
import numpy as np
import jax
import jax.numpy as jnp
from jax.experimental import pallas as pl
from jax.experimental.pallas import tpu as pltpu

K = 7            # ConvTranspose1d kernel size
STRIDE = 2       # poolstride
PAD = 3
OUT_PAD = STRIDE - 1
MAX_L_TILE = 512


def _round_up(v, m):
    return (v + m - 1) // m * m


def _pick_l_tile(L, max_tile=MAX_L_TILE):
    """Largest L-tile <= max_tile that divides L; multiples of 128 preferred."""
    if L <= max_tile:
        return L
    for t in range(max_tile, 0, -128):          # 512, 384, 256, 128
        if L % t == 0:
            return t
    return L                                    # no nice divisor: single tile


# --------------------------------------------------------------------------
# Kernel 1: transposed conv (single fused MXU dot) + per-step partial BN stats
# --------------------------------------------------------------------------
def _make_conv_kernel(c_out_p, l_tile, n_l_tiles):
    def convT_kernel(x_ref, w_ref, y_ref, psum_ref, psq_ref):
        # x_ref   : (1, C_in_p, L+3)      zero-padded input row (resident across L tiles)
        # w_ref   : (2*C_out_p, 4*C_in_p) stacked taps, [even rows ; odd rows]
        # y_ref   : (1, 2*C_out_p, l_tile) bf16 intermediate, [even ; odd] phases
        # psum/psq: (1, 1, C_out_p, 1)    per-(batch, L-tile) partial statistics
        if n_l_tiles == 1:
            base = 0
        else:
            base = pl.program_id(1) * l_tile
            if l_tile % 128 == 0:
                base = pl.multiple_of(base, 128)

        def win(d):  # (C_in_p, l_tile) window of the padded input at shift d
            return x_ref[0, :, pl.ds(base + d, l_tile)]

        # Column blocks of w_ref are ordered to match shifts [3, 2, 1, 0].
        xs = jnp.concatenate([win(3), win(2), win(1), win(0)], axis=0)
        acc = jnp.dot(w_ref[...], xs, preferred_element_type=jnp.float32)

        # Per-channel partial sums for BatchNorm batch statistics, accumulated
        # in f32 *before* the bf16 cast of the stored intermediate.
        s = jnp.sum(acc, axis=1, keepdims=True)          # (2*C_out_p, 1)
        q = jnp.sum(acc * acc, axis=1, keepdims=True)
        psum_ref[0, 0, :, :] = s[:c_out_p] + s[c_out_p:]
        psq_ref[0, 0, :, :] = q[:c_out_p] + q[c_out_p:]

        y_ref[0] = acc.astype(y_ref.dtype)

    return convT_kernel


# --------------------------------------------------------------------------
# Kernel 2: folded BN affine + ReLU + lane-dense even/odd interleave
# --------------------------------------------------------------------------
def _make_bn_relu_kernel(c_out_p):
    def bn_relu_kernel(y_ref, scale_ref, shift_ref, pe_ref, po_ref, o_ref):
        # y_ref       : (1, 2*C_out_p, l_tile) bf16, [even ; odd]
        # scale/shift : (2*C_out_p, 1) folded BN affine (duplicated per phase)
        # pe/po       : (l_tile, 2*l_tile) exact 0/1 spreading matrices
        # o_ref       : (1, C_out_p, 2*l_tile) final interleaved output (lane dense)
        y = y_ref[0].astype(jnp.float32)
        z = jnp.maximum(y * scale_ref[...] + shift_ref[...], 0.0)
        even = z[:c_out_p]
        odd = z[c_out_p:]
        o_ref[0] = (jnp.dot(even, pe_ref[...], preferred_element_type=jnp.float32)
                    + jnp.dot(odd, po_ref[...], preferred_element_type=jnp.float32))

    return bn_relu_kernel


# --------------------------------------------------------------------------
# Wrapper
# --------------------------------------------------------------------------
def conv_upsample(x, w, b, gamma, beta, eps=1e-5):
    """x: (N, C_in, L) f32.  w: (C_in, C_out, K) PyTorch ConvTranspose1d weight.

    `b` is accepted for interface parity but is mathematically absorbed by the
    training-mode BatchNorm (a per-channel bias only shifts the batch mean)."""
    del b
    N, C_in, L = x.shape
    C_out = w.shape[1]
    L_out = (L - 1) * STRIDE - 2 * PAD + K + OUT_PAD          # == 2 * L
    assert L_out == 2 * L

    C_ip = _round_up(C_in, 8)      # channel padding keeps sublane slices/concats tile aligned
    C_op = _round_up(C_out, 8)
    Lt = _pick_l_tile(L)
    nLt = L // Lt
    Lp = L + 3                     # 1 left / 2 right zero pad on the length axis

    # ---- operand preparation (tiny, once, in XLA) ----
    x_pad = jnp.pad(x.astype(jnp.float32), ((0, 0), (0, C_ip - C_in), (1, 2)))
    w_p = jnp.pad(w.astype(jnp.float32),
                  ((0, C_ip - C_in), (0, C_op - C_out), (0, 0)))
    w_t = jnp.transpose(w_p, (2, 1, 0))                        # (K, C_op, C_ip)
    zeros = jnp.zeros((C_op, C_ip), jnp.float32)
    # out[2m]   uses taps 1,3,5 at input shifts 2,1,0 (of the padded row)
    # out[2m+1] uses taps 0,2,4,6 at input shifts 3,2,1,0
    w_even = jnp.concatenate([zeros, w_t[1], w_t[3], w_t[5]], axis=1)
    w_odd = jnp.concatenate([w_t[0], w_t[2], w_t[4], w_t[6]], axis=1)
    w_all = jnp.concatenate([w_even, w_odd], axis=0)           # (2*C_op, 4*C_ip)

    # exact 0/1 spreading matrices: even -> output lanes 2m, odd -> lanes 2m+1
    m = np.arange(Lt)
    pe = np.zeros((Lt, 2 * Lt), np.float32); pe[m, 2 * m] = 1.0
    po = np.zeros((Lt, 2 * Lt), np.float32); po[m, 2 * m + 1] = 1.0
    pe = jnp.asarray(pe)
    po = jnp.asarray(po)

    vmem_cap = 32 * 1024 * 1024    # explicit limit: fits v7x's 64 MiB VMEM with headroom

    # ---- kernel 1: transposed conv + partial BN stats (both axes parallel) ----
    y, psum, psq = pl.pallas_call(
        _make_conv_kernel(C_op, Lt, nLt),
        out_shape=(jax.ShapeDtypeStruct((N, 2 * C_op, L), jnp.bfloat16),
                   jax.ShapeDtypeStruct((N, nLt, C_op, 1), jnp.float32),
                   jax.ShapeDtypeStruct((N, nLt, C_op, 1), jnp.float32)),
        grid_spec=pltpu.PrefetchScalarGridSpec(
            num_scalar_prefetch=0,
            grid=(N, nLt),
            in_specs=[pl.BlockSpec((1, C_ip, Lp), lambda n, t: (n, 0, 0)),
                      pl.BlockSpec((2 * C_op, 4 * C_ip), lambda n, t: (0, 0))],
            out_specs=(pl.BlockSpec((1, 2 * C_op, Lt), lambda n, t: (n, 0, t)),
                       pl.BlockSpec((1, 1, C_op, 1), lambda n, t: (n, t, 0, 0)),
                       pl.BlockSpec((1, 1, C_op, 1), lambda n, t: (n, t, 0, 0)))),
        compiler_params=pltpu.CompilerParams(
            dimension_semantics=("parallel", "parallel"),
            vmem_limit_bytes=vmem_cap),
    )(x_pad, w_all)

    # ---- BatchNorm1d training-mode statistics (biased variance), folded ----
    cnt = jnp.float32(N * L_out)
    s = jnp.sum(psum, axis=(0, 1))                             # (C_op, 1)
    q = jnp.sum(psq, axis=(0, 1))
    mean = s / cnt
    var = q / cnt - mean * mean
    # TODO(synk): E[x^2]-E[x]^2 can cancel for huge batches with large per-channel
    # offsets; a shifted / two-pass reduction would be safer at production scale.
    gamma_p = jnp.pad(gamma.astype(jnp.float32), (0, C_op - C_out),
                      constant_values=1.0).reshape(C_op, 1)
    beta_p = jnp.pad(beta.astype(jnp.float32),
                     (0, C_op - C_out)).reshape(C_op, 1)
    scale = gamma_p * jax.lax.rsqrt(var + eps)
    shift = beta_p - mean * scale
    scale2 = jnp.concatenate([scale, scale], axis=0)           # (2*C_op, 1)
    shift2 = jnp.concatenate([shift, shift], axis=0)

    # ---- kernel 2: folded BN affine + ReLU, emits interleaved output directly ----
    out_full = pl.pallas_call(
        _make_bn_relu_kernel(C_op),
        out_shape=jax.ShapeDtypeStruct((N, C_op, L_out), jnp.float32),
        grid_spec=pltpu.PrefetchScalarGridSpec(
            num_scalar_prefetch=0,
            grid=(N, nLt),
            in_specs=[pl.BlockSpec((1, 2 * C_op, Lt), lambda n, t: (n, 0, t)),
                      pl.BlockSpec((2 * C_op, 1), lambda n, t: (0, 0)),
                      pl.BlockSpec((2 * C_op, 1), lambda n, t: (0, 0)),
                      pl.BlockSpec((Lt, 2 * Lt), lambda n, t: (0, 0)),
                      pl.BlockSpec((Lt, 2 * Lt), lambda n, t: (0, 0))],
            out_specs=pl.BlockSpec((1, C_op, 2 * Lt), lambda n, t: (n, 0, t))),
        compiler_params=pltpu.CompilerParams(
            dimension_semantics=("parallel", "parallel"),
            vmem_limit_bytes=vmem_cap),
    )(y, scale2, shift2, pe, po)

    return out_full[:, :C_out, :]


# --------------------------------------------------------------------------
# Numpy reference: direct ConvTranspose1d scatter definition + BN(train) + ReLU
# --------------------------------------------------------------------------
def reference(x, w, b, gamma, beta, eps=1e-5):
    x = np.asarray(x, np.float64)
    w = np.asarray(w, np.float64)
    b = np.asarray(b, np.float64)
    gamma = np.asarray(gamma, np.float64)
    beta = np.asarray(beta, np.float64)
    N, Cin, L = x.shape
    Cout = w.shape[1]
    Lout = (L - 1) * STRIDE - 2 * PAD + K + OUT_PAD
    buf = np.zeros((N, Cout, 2 * L + K), np.float64)          # index j + PAD
    for k in range(K):
        contrib = np.einsum('nci,co->noi', x, w[:, :, k])     # (N, Cout, L)
        buf[:, :, k:k + 2 * L:2] += contrib                   # j = 2*i - PAD + k
    y = buf[:, :, PAD:PAD + Lout] + b[None, :, None]
    mean = y.mean(axis=(0, 2), keepdims=True)
    var = y.var(axis=(0, 2), keepdims=True)                   # biased, as in BN forward
    yn = (y - mean) / np.sqrt(var + eps) * gamma[None, :, None] + beta[None, :, None]
    return np.maximum(yn, 0.0)


def _run_case(key, N, in_ch, out_ch, L, tag):
    k1, k2, k3, k4, k5 = jax.random.split(key, 5)
    x = jax.random.normal(k1, (N, in_ch, L), jnp.float32)
    w = 0.3 * jax.random.normal(k2, (in_ch, out_ch, K), jnp.float32)
    b = 0.1 * jax.random.normal(k3, (out_ch,), jnp.float32)
    gamma = 1.0 + 0.1 * jax.random.normal(k4, (out_ch,), jnp.float32)
    beta = 0.1 * jax.random.normal(k5, (out_ch,), jnp.float32)

    out = jax.block_until_ready(conv_upsample(x, w, b, gamma, beta))
    assert out.shape == (N, out_ch, 2 * L), (tag, out.shape)
    ref = reference(x, w, b, gamma, beta)
    # tolerance accounts for the bf16 intermediate storage of the conv output
    np.testing.assert_allclose(np.asarray(out), ref, rtol=2e-2, atol=2e-2,
                               err_msg=tag)


if __name__ == "__main__":
    key = jax.random.PRNGKey(0)
    k_small, k_tiled = jax.random.split(key)
    # small shape matching the module defaults
    _run_case(k_small, N=2, in_ch=4, out_ch=8, L=16, tag="small")
    # shape exercising the L-tiling path (L_tile=256, 5 tiles) with clean channels
    _run_case(k_tiled, N=2, in_ch=8, out_ch=16, L=1280, tag="tiled")
    print("KERNEL_OK")
</pallas_src>

<mosaic_0001>
module attributes {stable_mosaic.version = 11 : i64} {
  func.func @convT_kernel(%arg0: i32, %arg1: i32, %arg2: memref<1x8x19xf32, #tpu.memory_space<vmem>>, %arg3: memref<16x32xf32, #tpu.memory_space<vmem>>, %arg4: memref<1x16x16xbf16, #tpu.memory_space<vmem>>, %arg5: memref<1x1x8x1xf32, #tpu.memory_space<vmem>>, %arg6: memref<1x1x8x1xf32, #tpu.memory_space<vmem>>) attributes {dimension_semantics = [#tpu.dimension_semantics<parallel>, #tpu.dimension_semantics<parallel>], iteration_bounds = array<i64: 2, 1>, scalar_prefetch = 0 : i64, scratch_operands = 0 : i64, tpu.core_type = #tpu.core_type<tc>, window_params = [{transform_indices = @transform_0, window_bounds = array<i64: 1, 8, 19>}, {pipeline_mode = #tpu.pipeline_mode<synchronous>, transform_indices = @transform_1, window_bounds = array<i64: 16, 32>}, {transform_indices = @transform_2, window_bounds = array<i64: 1, 16, 16>}, {transform_indices = @transform_3, window_bounds = array<i64: 1, 1, 8, 1>}, {transform_indices = @transform_4, window_bounds = array<i64: 1, 1, 8, 1>}]} {
    %c0 = arith.constant 0 : index
    %c0_0 = arith.constant 0 : index
    %c3 = arith.constant 3 : index
    %0 = vector.load %arg2[%c0, %c0_0, %c3] : memref<1x8x19xf32, #tpu.memory_space<vmem>>, vector<1x8x16xf32>
    %1 = vector.shape_cast %0 : vector<1x8x16xf32> to vector<8x16xf32>
    %c0_1 = arith.constant 0 : index
    %c0_2 = arith.constant 0 : index
    %c2 = arith.constant 2 : index
    %2 = vector.load %arg2[%c0_1, %c0_2, %c2] : memref<1x8x19xf32, #tpu.memory_space<vmem>>, vector<1x8x16xf32>
    %3 = vector.shape_cast %2 : vector<1x8x16xf32> to vector<8x16xf32>
    %c0_3 = arith.constant 0 : index
    %c0_4 = arith.constant 0 : index
    %c1 = arith.constant 1 : index
    %4 = vector.load %arg2[%c0_3, %c0_4, %c1] : memref<1x8x19xf32, #tpu.memory_space<vmem>>, vector<1x8x16xf32>
    %5 = vector.shape_cast %4 : vector<1x8x16xf32> to vector<8x16xf32>
    %c0_5 = arith.constant 0 : index
    %c0_6 = arith.constant 0 : index
    %c0_7 = arith.constant 0 : index
    %6 = vector.load %arg2[%c0_5, %c0_6, %c0_7] : memref<1x8x19xf32, #tpu.memory_space<vmem>>, vector<1x8x16xf32>
    %7 = vector.shape_cast %6 : vector<1x8x16xf32> to vector<8x16xf32>
    %8 = tpu.concatenate %1, %3, %5, %7 in 0 : vector<8x16xf32>, vector<8x16xf32>, vector<8x16xf32>, vector<8x16xf32> -> vector<32x16xf32>
    %c0_8 = arith.constant 0 : index
    %c0_9 = arith.constant 0 : index
    %9 = vector.load %arg3[%c0_8, %c0_9] : memref<16x32xf32, #tpu.memory_space<vmem>>, vector<16x32xf32>
    %cst = arith.constant dense<0.000000e+00> : vector<16x16xf32>
    %10 = tpu.matmul %9, %8, %cst {dimension_numbers = #tpu.dot_dimension_numbers<[1], [0], [0], [1], [0, 0, 1, 1], [], []>} : vector<16x32xf32>, vector<32x16xf32>, vector<16x16xf32> -> vector<16x16xf32>
    %cst_10 = arith.constant dense<0.000000e+00> : vector<16xf32>
    %11 = vector.multi_reduction <add>, %10, %cst_10 [1] : vector<16x16xf32> to vector<16xf32>
    %12 = vector.shape_cast %11 : vector<16xf32> to vector<16x1xf32>
    %13 = arith.mulf %10, %10 : vector<16x16xf32>
    %cst_11 = arith.constant dense<0.000000e+00> : vector<16xf32>
    %14 = vector.multi_reduction <add>, %13, %cst_11 [1] : vector<16x16xf32> to vector<16xf32>
    %15 = vector.shape_cast %14 : vector<16xf32> to vector<16x1xf32>
    %16 = vector.extract_strided_slice %12 {offsets = [0, 0], sizes = [8, 1], strides = [1, 1]} : vector<16x1xf32> to vector<8x1xf32>
    %17 = vector.extract_strided_slice %12 {offsets = [8, 0], sizes = [8, 1], strides = [1, 1]} : vector<16x1xf32> to vector<8x1xf32>
    %18 = arith.addf %16, %17 : vector<8x1xf32>
    %c0_12 = arith.constant 0 : index
    %c0_13 = arith.constant 0 : index
    %c0_14 = arith.constant 0 : index
    %c0_15 = arith.constant 0 : index
    %19 = vector.load %arg5[%c0_12, %c0_13, %c0_14, %c0_15] : memref<1x1x8x1xf32, #tpu.memory_space<vmem>>, vector<1x1x8x1xf32>
    %20 = vector.shape_cast %19 : vector<1x1x8x1xf32> to vector<8x1xf32>
    %21 = vector.shape_cast %18 : vector<8x1xf32> to vector<1x1x8x1xf32>
    tpu.vector_store %arg5[%c0_12, %c0_13, %c0_14, %c0_15], %21 {strides = array<i32>} : memref<1x1x8x1xf32, #tpu.memory_space<vmem>>, vector<1x1x8x1xf32>,
    %22 = vector.extract_strided_slice %15 {offsets = [0, 0], sizes = [8, 1], strides = [1, 1]} : vector<16x1xf32> to vector<8x1xf32>
    %23 = vector.extract_strided_slice %15 {offsets = [8, 0], sizes = [8, 1], strides = [1, 1]} : vector<16x1xf32> to vector<8x1xf32>
    %24 = arith.addf %22, %23 : vector<8x1xf32>
    %c0_16 = arith.constant 0 : index
    %c0_17 = arith.constant 0 : index
    %c0_18 = arith.constant 0 : index
    %c0_19 = arith.constant 0 : index
    %25 = vector.load %arg6[%c0_16, %c0_17, %c0_18, %c0_19] : memref<1x1x8x1xf32, #tpu.memory_space<vmem>>, vector<1x1x8x1xf32>
    %26 = vector.shape_cast %25 : vector<1x1x8x1xf32> to vector<8x1xf32>
    %27 = vector.shape_cast %24 : vector<8x1xf32> to vector<1x1x8x1xf32>
    tpu.vector_store %arg6[%c0_16, %c0_17, %c0_18, %c0_19], %27 {strides = array<i32>} : memref<1x1x8x1xf32, #tpu.memory_space<vmem>>, vector<1x1x8x1xf32>,
    %28 = arith.truncf %10 : vector<16x16xf32> to vector<16x16xbf16>
    %c0_20 = arith.constant 0 : index
    %c0_21 = arith.constant 0 : index
    %c0_22 = arith.constant 0 : index
    %29 = vector.load %arg4[%c0_20, %c0_21, %c0_22] : memref<1x16x16xbf16, #tpu.memory_space<vmem>>, vector<1x16x16xbf16>
    %30 = vector.shape_cast %29 : vector<1x16x16xbf16> to vector<16x16xbf16>
    %31 = vector.shape_cast %28 : vector<16x16xbf16> to vector<1x16x16xbf16>
    tpu.vector_store %arg4[%c0_20, %c0_21, %c0_22], %31 {strides = array<i32>} : memref<1x16x16xbf16, #tpu.memory_space<vmem>>, vector<1x16x16xbf16>,
    return
  }
  func.func @transform_0(%arg0: i32, %arg1: i32) -> (i32, i32, i32) {
    %c0_i32 = arith.constant 0 : i32
    %c0_i32_0 = arith.constant 0 : i32
    %c0_i32_1 = arith.constant 0 : i32
    return %arg0, %c0_i32, %c0_i32_0 : i32, i32, i32
  }
  func.func @transform_1(%arg0: i32, %arg1: i32) -> (i32, i32) {
    %c0_i32 = arith.constant 0 : i32
    %c0_i32_0 = arith.constant 0 : i32
    %c0_i32_1 = arith.constant 0 : i32
    return %c0_i32, %c0_i32_0 : i32, i32
  }
  func.func @transform_2(%arg0: i32, %arg1: i32) -> (i32, i32, i32) {
    %c0_i32 = arith.constant 0 : i32
    %c0_i32_0 = arith.constant 0 : i32
    return %arg0, %c0_i32, %arg1 : i32, i32, i32
  }
  func.func @transform_3(%arg0: i32, %arg1: i32) -> (i32, i32, i32, i32) {
    %c0_i32 = arith.constant 0 : i32
    %c0_i32_0 = arith.constant 0 : i32
    %c0_i32_1 = arith.constant 0 : i32
    return %arg0, %arg1, %c0_i32, %c0_i32_0 : i32, i32, i32, i32
  }
  func.func @transform_4(%arg0: i32, %arg1: i32) -> (i32, i32, i32, i32) {
    %c0_i32 = arith.constant 0 : i32
    %c0_i32_0 = arith.constant 0 : i32
    %c0_i32_1 = arith.constant 0 : i32
    return %arg0, %arg1, %c0_i32, %c0_i32_0 : i32, i32, i32, i32
  }
}

</mosaic_0001>

<bundles_post_ra>
// kernel: tpu_custom_call.1
= control target key start
LH: loop header
LB: loop body
LE: loop exit
PB: predicated region body
PF: predicated region fallthrough
CT: control target
= control target key end

     0   :  { %10 = vsyncpa [#allocation3], 0  ;;  %s1161_s0 = inlined_call_operand.hbm [shape: f32[2,8,19], index: 0, kind: input, shape index: {}]   ;;  %s1162_s1 = inlined_call_operand.hbm [shape: f32[16,32], index: 1, kind: input, shape index: {}]   ;;  %s1163_s2 = inlined_call_operand.hbm [shape: bf16[2,16,16], index: 2, kind: output, shape index: {0}]   ;;  %s1164_s3 = inlined_call_operand.vmem [shape: f32[2,1,8,1], index: 3, kind: output, shape index: {1}]   ;;  %s1165_s4 = inlined_call_operand.vmem [shape: f32[2,1,8,1], index: 4, kind: output, shape index: {2}]  }
   0x1   :  { %12 = vsyncpa [#allocation3 + $0x1], 0 }
   0x2   :  { %13 = vsyncpa [#allocation6], 0 }
   0x3   :  { %14 = vsyncpa [#allocation4], 0 }
   0x4   :  { %16 = vsyncpa [#allocation4 + $0x1], 0  ;;  %s927_s15 = smov 0   ;;  %s929_s16 = smov 0  }
   0x5   :  { %s931_s17 = smov 0   ;;  %s933_s18 = smov 0  }
   0x6   :  { %s935_s19 = smov 0   ;;  %s937_s20 = smov 0  }
   0x7 LB: > { %s604_s21 = sadd.s32 4294967295, %s889_s20   ;;  %s605_s22 = sadd.s32 4294967294, %s889_s20   ;;  %s889_s20 = sphi %s937_s20, %s22_s20   ;;  %s885_s19 = sphi %s935_s19, %s1189_s19   ;;  %s881_s18 = sphi %s933_s18, %s1188_s18   ;;  %s877_s17 = sphi %s931_s17, %s1187_s17   ;;  %s873_s16 = sphi %s929_s16, %s1186_s16   ;;  %s869_s15 = sphi %s927_s15, %s1185_s15  }
   0x8   : > { %p54_p0 = scmp.ne.s32.totalorder %s873_s16, %s869_s15  ;;  %p961_p1 = scmp.eq.s32.totalorder %s604_s21, 0 }
   0x9   : > { %p965_p2 = scmp.eq.s32.totalorder %s604_s21, 1  ;;  %p107_p3 = scmp.eq.s32.totalorder %s605_s22, 1 }
   0xa   : > { %s1170_s23 = scalar_select %p961_p1, 1, 0 }
   0xb   : > { %s1171_s24 = scalar_select %p965_p2, 1, 0 }
   0xc   : > { %p971_p4 = por %p961_p1, %p54_p0  ;;  %p606_p5 = scmp.ge.s32.totalorder %s889_s20, 1 }
   0xd   : > { %p976_p6 = por %p107_p3, %p54_p0  ;;  %p170_p7 = scmp.lt.s32.totalorder %s889_s20, 3 }
   0xe   : > { %s1172_s25 = scalar_select %p971_p4, 1, 0 }
   0xf   : > { %s1173_s26 = scalar_select %p976_p6, 1, 0 }
  0x10   : > { %p981_p8 = pnand %p606_p5, %p170_p7  ;;  %s891_s28 = smov [#allocation5]  }
  0x11   : > { %s182_s29 = sshll.u32 %s891_s28, 4  ;;  %s34_s5 = sadd.s32 1, %s885_s19  ;;  %s183_s29 = int_to_ptr.vmem [resolvable:$true] %s182_s29 }
  0x12   : > { %s1174_s27 = scalar_select %p981_p8, 1, 0 }
  0x13   : > { %p662_p9 = pneg %p981_p8  ;;  %s745_s8 = scalar_lea.hbm %s1162_s1, 256 }
  0x14   : > { %p746_p12 = scmp.ne.s32.totalorder %s1162_s1, %s745_s8  ;;  %p752_p5 = scmp.lt.u32.totalorder %s745_s8, %s1162_s1 }
  0x15   : > { %p990_p11 = pnand %p662_p9, %p961_p1 }
  0x17   : > { %p747_p13 = pneg %p990_p11 }
  0x19   : > { %p748_p0 = pnand %p747_p13, %p746_p12 }
  0x1b   : > { %p749_p3 = pneg %p748_p0 }
  0x1d   : > { %p754_p7 = pnand %p752_p5, %p749_p3 }
  0x1f   : > { %757 = shalt.err (!%p754_p7)
}
  0x20   : > { %s758_s13 = scalar_lea.vmem %s183_s29, 256  ;;  %p766_p1 = scmp.lt.s32.totalorder %s183_s29, %s183_s29 }
  0x21   : > { %p759_p9 = scmp.ne.s32.totalorder %s183_s29, %s758_s13  ;;  %p767_p4 = scmp.lt.s32.totalorder %s758_s13, %s758_s13 }
  0x23   : > { %p761_p10 = pnand %p759_p9, %p747_p13  ;;  %p768_p8 = por %p767_p4, %p766_p1 }
  0x25   : > { %p762_p6 = pneg %p761_p10 }
  0x27   : > { %p769_p2 = pnand %p768_p8, %p762_p6 }
  0x29   : > { %772 = shalt.err (!%p769_p2)
}
  0x2a   : > { %s892_s14 = smov 128   ;;  %s893_s21 = smov 8  }
  0x2b   : > { %665 = dma.hbm_to_vmem [thread:$0]  (!%p990_p11), %s1162_s1, 256, %s183_s29, [#allocation6], %s892_s14, %s892_s14, %s893_s21  }
  0x2c   : > { %p36_p1 = scmp.ge.s32.totalorder %s34_s5, 2  ;;  %s41_s6 = sadd.s32 1, %s877_s17 }
  0x2d   : > { %p48_p2 = scmp.ne.s32.totalorder %s877_s17, %s873_s16  ;;  %p49_p4 = scmp.eq.s32.totalorder %s889_s20, 0 }
  0x2e   : > { %s1191_s5 = smov (%p36_p1, %s34_s5), 0  ;;  %p1177_p8 = scmp.ne.s32.totalorder %s1171_s24, 0 }
  0x2f   : > { %p1017_p6 = por %p49_p4, %p48_p2  ;;  %s38_s30 = ssub.s32 %s885_s19, %s1191_s5 }
  0x30   : > { %p1023_p10 = por %p1177_p8, %p48_p2  ;;  %p675_p12 = scmp.lt.s32.totalorder %s889_s20, 2 }
  0x31   : > { %p39_p11 = scmp.eq.s32.totalorder %s38_s30, 0  ;;  %s196_s29 = sand.u32 1, %s877_s17  }
  0x32   : > { %s609_s9 = sshll.u32 %s196_s29, 3  ;;  %s610_s11 = sshll.u32 %s885_s19, 7 }
  0x33   : > { %s1032_s10 = scalar_select %p39_p11, %s877_s17, %s41_s6  }
  0x34   : > { %s1038_s14 = scalar_lea.hbm %s1161_s0, %s610_s11  ;;  %s200_s24 = scalar_lea.vmem [#allocation2], %s609_s9 }
  0x35   : > { %s207_s21 = sshll.u32 %s200_s24, 4  ;;  %p1044_p13 = pnand %p675_p12, %p1017_p6  ;;  %s1040_s21 = int_to_ptr.vmem [resolvable:$true] %s207_s21 }
  0x36   : > { %s197_s28 = scalar_lea.sflag [#allocation3], %s196_s29  ;;  %s773_s6 = scalar_lea.hbm %s1038_s14, 128 }
  0x37   : > { %p774_p0 = scmp.ne.s32.totalorder %s1038_s14, %s773_s6  ;;  %p775_p3 = pneg %p1044_p13 }
  0x38   : > { %s778_s11 = scalar_lea.hbm %s1161_s0, 256  ;;  %p779_p9 = scmp.lt.u32.totalorder %s1038_s14, %s1161_s0 }
  0x39   : > { %p776_p5 = pnand %p775_p3, %p774_p0  ;;  %p780_p1 = scmp.lt.u32.totalorder %s778_s11, %s773_s6 }
  0x3a   : > { %p782_p4 = scmp.lt.u32.totalorder %s773_s6, %s1038_s14 }
  0x3b   : > { %p777_p7 = pneg %p776_p5  ;;  %p781_p2 = por %p780_p1, %p779_p9 }
  0x3d   : > { %p783_p6 = por %p782_p4, %p781_p2 }
  0x3f   : > { %p784_p8 = pnand %p783_p6, %p777_p7 }
  0x41   : > { %787 = shalt.err (!%p784_p8)
}
  0x42   : > { %s788_s29 = scalar_lea.vmem %s1040_s21, 128  ;;  %s894_s13 = smov [#allocation2]  }
  0x43   : > { %p789_p12 = scmp.ne.s32.totalorder %s1040_s21, %s788_s29  ;;  %s793_s24 = sshll.u32 %s894_s13, 4  ;;  %s794_s24 = int_to_ptr.vmem [resolvable:$false] %s793_s24 }
  0x44   : > { %s795_s30 = scalar_lea.vmem %s794_s24, 256  ;;  %p796_p5 = scmp.lt.s32.totalorder %s1040_s21, %s794_s24 }
  0x45   : > { %p791_p11 = pnand %p789_p12, %p775_p3  ;;  %p797_p9 = scmp.lt.s32.totalorder %s795_s30, %s788_s29 }
  0x47   : > { %p792_p0 = pneg %p791_p11  ;;  %p798_p1 = por %p797_p9, %p796_p5 }
  0x49   : > { %p799_p2 = pnand %p798_p1, %p792_p0 }
  0x4b   : > { %802 = shalt.err (!%p799_p2)
}
  0x4c   : > { %669 = dma.hbm_to_vmem [thread:$0]  (!%p1044_p13), %s1038_s14, 128, %s1040_s21, %s197_s28  }
  0x4d   : > { %p1180_p7 = scmp.ne.s32.totalorder %s1174_s27, 0 }
  0x4e   : > { %s1076_s6 = sand.u32 (!%p1180_p7), 1, %s873_s16   ;;  %p1181_p3 = scmp.ne.s32.totalorder (!%p1180_p7), %s1172_s25, 0 }
  0x4f   : > { %216 = sbr.rel (%p1180_p7) target bundleno = 698 (0x2ba), region = 28  ;;  %s612_s9 = sshll.u32 (!%p1180_p7), %s1076_s6, 3 }
  0x50   : > { %s219_s11 = scalar_lea.sflag (!%p1180_p7), [#allocation3], %s1076_s6  ;;  %s222_s7 = scalar_lea.vmem (!%p1180_p7), [#allocation2], %s612_s9 }
  0x56   : > { %856 = dma.done.wait (%p1181_p3), %s219_s11, 128  }
  0x57   : > { %858 = vsyncadd (%p1181_p3), %s219_s11, 4294967168  ;;  %p1182_p13 = scmp.ne.s32.totalorder %s1170_s23, 0 }
  0x59   : > { %860 = dma.done.wait (%p1182_p13), [#allocation6], 256  }
  0x5a   : > { %862 = vsyncadd (%p1182_p13), [#allocation6], 4294967040  ;;  %v279_v0 = vld [vmem:[%s222_s7] sm:$0xff]  ;;  %s895_s27 = smov 1   ;;  %s896_s14 = smov 3   ;;  %v287_v1 = vld [vmem:[#allocation5] sm:$0xff] }
  0x5b   : > { %281 = vrot.lane.b32.xlu0 %v279_v0, %s895_s27  ;;  %285 = vrot.lane.b32.xlu1 %v279_v0, %s896_s14  ;;  %s897_s21 = smov 2   ;;  %vm301_vm0 = vcmask 261120   ;;  %s898_s25 = smov 125   ;;  %v288_v15 = vld [vmem:[#allocation5 + $0x8] sm:$0xff]  ;;  %vm383_vm1 = vcmask 130048   ;;  %vm411_vm2 = vcmask 125952  }
  0x5c   : > { %643 = vmatprep.mubr.msk.f32.mxu0 %vm301_vm0, %v287_v1  ;;  %s246_s23 = scalar_lea.vmem [#allocation7], %s612_s9  ;;  %s628_s22 = sshll.u32 %s881_s18, 7 }
  0x5d   : > { %s443_s28 = sshll.u32 %s246_s23, 4  ;;  %s1102_s13 = scalar_lea.hbm %s1163_s2, %s628_s22  ;;  %s1104_s28 = int_to_ptr.vmem [resolvable:$true] %s443_s28 }
  0x5e   : > { %s415_s24 = scalar_lea.sflag [#allocation4], %s1076_s6  ;;  %s803_s30 = scalar_lea.vmem %s1104_s28, 128 }
  0x5f   : > { %283 = vrot.lane.b32.xlu0 %v279_v0, %s897_s21  ;;  %p804_p4 = scmp.ne.s32.totalorder %s1104_s28, %s803_s30  ;;  %s899_s9 = smov [#allocation7]  }
  0x60   : > { %s807_s11 = sshll.u32 %s899_s9, 4  ;;  %s808_s11 = int_to_ptr.vmem [resolvable:$false] %s807_s11 }
  0x61   : > { %p805_p6 = pnand %p804_p4, %p1023_p10  ;;  %s809_s7 = scalar_lea.vmem %s808_s11, 256 }
  0x62   : > { %p810_p12 = scmp.lt.s32.totalorder %s1104_s28, %s808_s11  ;;  %p811_p11 = scmp.lt.s32.totalorder %s809_s7, %s803_s30 }
  0x63   : > { %p806_p8 = pneg %p805_p6 }
  0x64   : > { %p812_p0 = por %p811_p11, %p810_p12 }
  0x66   : > { %p813_p5 = pnand %p812_p0, %p806_p8 }
  0xcd   : > { %v282_v2 = vpop.permute.xlu0 %281  ;;  %v286_v4 = vpop.permute.xlu1 %285 }
  0xce   : > { %v735_v3 = vpack.i.bf16 %v282_v2, %v279_v0 }
  0xd0   : > { %736 = vrot.lane.b32.xlu1 %v735_v3, %s898_s25 }
  0xd1   : > { %v284_v5 = vpop.permute.xlu0 %283 }
  0xd2   : > { %v740_v6 = vpack.i.bf16 %v286_v4, %v284_v5 }
  0xd4   : > { %741 = vrot.lane.b32.xlu0 %v740_v6, %s898_s25 }
 0x142   : > { %v737_v7 = vpop.permute.xlu1 %736 }
 0x143   : > { %v739_v8 = vunpack.i.h.bf16 %v737_v7  ;;  %v738_v9 = vunpack.i.l.bf16 %v737_v7 }
 0x145   : > { %v646_v10 = vpack.c.bf16 %v739_v8, %v738_v9 }
 0x146   : > { %v742_v11 = vpop.permute.xlu0 %741 }
 0x147   : > { %v744_v12 = vunpack.i.h.bf16 %v742_v11  ;;  %v743_v13 = vunpack.i.l.bf16 %v742_v11  ;;  %647 = vmatprep.subr.bf16.mxu0 %v646_v10 }
 0x148   : > { %649 = vmatpush3.bf16.msra.mxu0 %v646_v10 }
 0x149   : > { %v650_v14 = vpack.c.bf16 %v744_v12, %v743_v13 }
 0x14b   : > { %651 = vmatprep.subr.bf16.mxu0 %v650_v14 }
 0x14c   : > { %653 = vmatpush3.bf16.msra.mxu0 %v650_v14 }
 0x14f   : > { %644 = vmatmul.mubr.msk.f32.vlgmr.msra.gmra.mrb[0].mxu0 %vm301_vm0, %v288_v15 }
 0x222   : > { %v645_v16 = vpop.f32.mrb[0].mxu0 }
 0x223   : > { %v627_v17 = vpack.c.bf16 %v645_v16, %v645_v16  ;;  %v374_v18 = vpop.f32.mrb[1].mxu0  ;;  %v387_v19 = vsel %vm383_vm1, %v645_v16, 0.0  ;;  %v391_v23 = vmul.f32 %v645_v16, %v645_v16 }
 0x224   : > { %v390_v20 = vmul.f32 %v374_v18, %v374_v18  ;;  %v626_v21 = vpack.c.bf16 %v374_v18, %v374_v18  ;;  %388 = vadd.xlane.f32.xlu0 %v387_v19  ;;  %v384_v22 = vsel %vm383_vm1, %v374_v18, 0.0 }
 0x225   : > { %413 = vst.msk [vmem:[%s246_s23 + $0x4] sm:$0xf] %vm411_vm2, %v627_v17  ;;  %385 = vadd.xlane.f32.xlu1 %v384_v22  ;;  %v395_v25 = vsel %vm383_vm1, %v391_v23, 0.0 }
 0x226   : > { %412 = vst.msk [vmem:[%s246_s23] sm:$0xf] %vm411_vm2, %v626_v21  ;;  %v392_v24 = vsel %vm383_vm1, %v390_v20, 0.0 }
 0x228   : > { %393 = vadd.xlane.f32.xlu0 %v392_v24 }
 0x229   : > { %396 = vadd.xlane.f32.xlu1 %v395_v25 }
 0x22a   : > { %816 = shalt.err (!%p813_p5)
}
 0x22b   : > { %s817_s27 = scalar_lea.hbm %s1102_s13, 128  ;;  %s821_s25 = scalar_lea.hbm %s1163_s2, 256 }
 0x22c   : > { %p818_p9 = scmp.ne.s32.totalorder %s1102_s13, %s817_s27  ;;  %p822_p7 = scmp.lt.u32.totalorder %s1102_s13, %s1163_s2 }
 0x22d   : > { %p823_p3 = scmp.lt.u32.totalorder %s821_s25, %s817_s27  ;;  %p825_p4 = scmp.lt.u32.totalorder %s817_s27, %s1102_s13 }
 0x22e   : > { %p819_p1 = pnand %p818_p9, %p1023_p10 }
 0x22f   : > { %p824_p13 = por %p823_p3, %p822_p7 }
 0x230   : > { %p820_p2 = pneg %p819_p1 }
 0x231   : > { %p826_p6 = por %p825_p4, %p824_p13 }
 0x233   : > { %p827_p8 = pnand %p826_p6, %p820_p2 }
 0x235   : > { %830 = shalt.err (!%p827_p8)
}
 0x236   : > { %s900_s12 = smov 64   ;;  %s901_s29 = smov 4   ;;  %vm399_vm3 = vcmask 7168  }
 0x237   : > { %660 = dma.vmem_to_hbm [thread:$0]  (%p1023_p10), %s1104_s28, 128, %s1102_s13, %s415_s24, %s900_s12, %s900_s12, %s901_s29  }
 0x238   : > { %p265_p12 = scmp.lt.s32.totalorder %s881_s18, 1 }
 0x23a   : > { %s1193_s18 = smov (!%p265_p12, %s881_s18), 1 }
 0x23b   : > { %s615_s30 = sshll.u32 %s1193_s18, 3 }
 0x23c   : > { %s271_s7 = scalar_lea.vmem %s1164_s3, %s615_s30  ;;  %s278_s21 = scalar_lea.vmem %s1165_s4, %s615_s30 }
 0x2b1   : > { %v389_v26 = vpop.xlane.xlu0 %388 }
 0x2b2   : > { %v386_v27 = vpop.xlane.xlu1 %385 }
 0x2b3   : > { %v398_v28 = vadd.f32 %v389_v26, %v386_v27 }
 0x2b5   : > { %400 = vst.msk [vmem:[%s271_s7] sm:$0xff] %vm399_vm3, %v398_v28  ;;  %v394_v29 = vpop.xlane.xlu0 %393 }
 0x2b6   : > { %v397_v30 = vpop.xlane.xlu1 %396 }
 0x2b7   : > { %v401_v31 = vadd.f32 %v397_v30, %v394_v29 }
 0x2b9   : > { %402 = vst.msk [vmem:[%s278_s21] sm:$0xff] %vm399_vm3, %v401_v31 }
 0x2ba PF: > { %s464_s18 = sand.u32 1, %s869_s15   ;;  %p1183_p10 = scmp.ne.s32.totalorder %s1173_s26, 0 }
 0x2bb   : > { %p1184_p11 = scmp.ge.s32.totalorder %s889_s20, 2  ;;  %s465_s8 = scalar_lea.sflag [#allocation4], %s464_s18 }
 0x2bd   : > { %p671_p0 = pnand %p1184_p11, %p1183_p10 }
 0x2bf   : > { %864 = dma.done.wait (!%p671_p0), %s465_s8, 128  }
 0x2c0   : > { %866 = vsyncadd (!%p671_p0), %s465_s8, 4294967168  ;;  %s22_s20 = sadd.s32 1, %s889_s20   ;;  %s1185_s15 = smov %s873_s16 }
 0x2c1   : > { %p19_p5 = scmp.ge.s32.totalorder %s22_s20, 4   ;;  %s1186_s16 = smov %s877_s17 }
 0x2c2   : > { %s1187_s17 = smov %s1032_s10  ;;  %s1188_s18 = smov %s885_s19 }
 0x2c3   : > { %s1189_s19 = smov %s1191_s5  ;;  %21 = sbr.rel (!%p19_p5) target bundleno = 7 (0x7), region = 101 }
 0x2ca   :  { %490 = vsyncpa [#allocation3], 1 }
 0x2cb   :  { %492 = vsyncpa [#allocation3 + $0x1], 1 }
 0x2cc   :  { %493 = vsyncpa [#allocation6], 1 }
 0x2cd   :  { %494 = vsyncpa [#allocation4], 1 }
 0x2ce   :  { %496 = vsyncpa [#allocation4 + $0x1], 1 }

</bundles_post_ra>
